<compile_context>
chip_gen: v7x
topology: tpu7x:2x2x1
jax: 0.10.0
libtpu: 0.0.40
codegen_flags: <defaults>
</compile_context>

<pallas_src>
import functools

import jax
import jax.numpy as jnp
from jax.experimental import pallas as pl
from jax.experimental.pallas import tpu as pltpu


# ---------------------------------------------------------------------------
# Kernels
# ---------------------------------------------------------------------------

def _rmsnorm_affine_kernel(x_ref, w_ref, o_ref, *, eps, x_dtype):
    # x_ref: (tile_rows, dim), w_ref: (1, dim), o_ref: (tile_rows, dim)
    x_f32 = x_ref[...].astype(jnp.float32)                      # x.float()
    ms = jnp.mean(x_f32 * x_f32, axis=-1, keepdims=True)        # mean(x^2, -1)
    normed = x_f32 * jax.lax.rsqrt(ms + eps)                    # * rsqrt(ms+eps)
    normed = normed.astype(x_dtype)                             # .type_as(x)
    o_ref[...] = (normed * w_ref[...]).astype(o_ref.dtype)      # * weight


def _rmsnorm_kernel(x_ref, o_ref, *, eps, x_dtype):
    x_f32 = x_ref[...].astype(jnp.float32)
    ms = jnp.mean(x_f32 * x_f32, axis=-1, keepdims=True)
    normed = x_f32 * jax.lax.rsqrt(ms + eps)
    o_ref[...] = normed.astype(x_dtype).astype(o_ref.dtype)


# ---------------------------------------------------------------------------
# Generation-aware sizing helpers
# ---------------------------------------------------------------------------

_TARGET_X_BLOCK_BYTES = 4 * 1024 * 1024   # ~4 MiB of x per block (all gens)
_MIN_GRID_BLOCKS = 4                      # keep >=~4 blocks when rows allow


def _vmem_capacity_bytes() -> int:
    """Physical VMEM per core; conservative fallback if query unavailable."""
    try:
        return int(pltpu.get_tpu_info().vmem_capacity_bytes)
    except Exception:
        return 64 * 1024 * 1024   # assume the smallest (v7x-like) part


def _sublane_pack(dtype) -> int:
    # f32 -> 8, bf16 -> 16, int8/fp8 -> 32 (sub-32-bit dtypes pack along sublanes)
    return max(8, 32 // jnp.dtype(dtype).itemsize)


def _round_up(x: int, m: int) -> int:
    return ((x + m - 1) // m) * m


def _choose_tile_rows(rows, dim, x_dtype, out_dtype, vmem_cap) -> int:
    x_b = jnp.dtype(x_dtype).itemsize
    o_b = jnp.dtype(out_dtype).itemsize
    pack = max(_sublane_pack(x_dtype), _sublane_pack(out_dtype))

    # Double-buffered input + output, plus headroom (~2 f32 temps) for the
    # in-kernel f32 intermediates the compiler may materialize in VMEM.
    per_row_bytes = dim * (2 * x_b + 2 * o_b + 8)

    # Generation-aware data budget: big parts (128 MiB VMEM) get a big budget;
    # v7x (64 MiB physical) stays tighter so the total footprint clears VMEM.
    if vmem_cap >= 96 * 1024 * 1024:
        data_budget = 48 * 1024 * 1024
    else:
        data_budget = 28 * 1024 * 1024

    # Byte-targeted tile: ~4 MiB of x per block.
    tile = max(_TARGET_X_BLOCK_BYTES // max(dim * x_b, 1), 1)
    # ...but never exceed the double-buffered data budget.
    tile = min(tile, data_budget // max(per_row_bytes, 1))
    tile = (tile // pack) * pack
    tile = max(tile, pack)

    # Never make the block (much) taller than the actual row count.
    rows_up = _round_up(rows, pack)
    tile = min(tile, rows_up)

    # Grid-collapse guard: keep ~>=_MIN_GRID_BLOCKS blocks when rows allow, so
    # both v7x TensorCores get work and the pipeline has steps to overlap.
    if rows_up >= _MIN_GRID_BLOCKS * pack:
        tile = min(tile, _round_up(pl.cdiv(rows, _MIN_GRID_BLOCKS), pack))

    return max(tile, pack)


def _choose_vmem_limit(tile_rows, dim, x_dtype, out_dtype, w_dtype, vmem_cap) -> int:
    x_b = jnp.dtype(x_dtype).itemsize
    o_b = jnp.dtype(out_dtype).itemsize
    w_b = 0 if w_dtype is None else jnp.dtype(w_dtype).itemsize
    # 2x double-buffered in + out blocks, weight row, ~2 f32 temp blocks.
    footprint = (2 * tile_rows * dim * (x_b + o_b)
                 + dim * w_b
                 + 2 * tile_rows * dim * 4)
    limit = int(footprint * 1.25) + (4 << 20)          # +25% slack + fixed pad
    limit = max(limit, 32 << 20)                       # above scoped defaults
    limit = min(limit, vmem_cap - (16 << 20))          # leave Mosaic headroom
    return limit


# ---------------------------------------------------------------------------
# Wrapper
# ---------------------------------------------------------------------------

def stepvideo_rmsnorm(x, weight=None, eps=1e-6, cast_weight_to_input_dtype=True):
    """RMSNorm over the last axis of x, matching StepVideoRMSNorm.forward.

    cast_weight_to_input_dtype=True keeps the output in x.dtype (halves output
    writeback bytes for bf16-in / f32-weight).  Pass False for strict PyTorch
    type-promotion of `normed.type_as(x) * weight`.
    """
    orig_shape = x.shape
    dim = orig_shape[-1]
    rows = 1
    for s in orig_shape[:-1]:
        rows *= s
    x2d = x.reshape(rows, dim)

    elementwise_affine = weight is not None
    if elementwise_affine:
        if cast_weight_to_input_dtype:
            weight = weight.astype(x.dtype)
        w2d = weight.reshape(1, dim)
        out_dtype = jnp.promote_types(x.dtype, w2d.dtype)
        w_dtype = w2d.dtype
    else:
        w2d = None
        out_dtype = x.dtype
        w_dtype = None

    vmem_cap = _vmem_capacity_bytes()
    tile_rows = _choose_tile_rows(rows, dim, x.dtype, out_dtype, vmem_cap)
    grid = (pl.cdiv(rows, tile_rows),)   # ragged last block handled by masking

    x_bytes = jnp.dtype(x.dtype).itemsize
    o_bytes = jnp.dtype(out_dtype).itemsize
    bytes_accessed = rows * dim * (x_bytes + o_bytes)
    if elementwise_affine:
        bytes_accessed += dim * jnp.dtype(w_dtype).itemsize
    cost = pl.CostEstimate(
        flops=5 * rows * dim,        # square + reduce + normalize + weight mul
        transcendentals=rows,        # one rsqrt per row
        bytes_accessed=bytes_accessed,
    )

    compiler_params = pltpu.CompilerParams(
        dimension_semantics=("parallel",),
        vmem_limit_bytes=_choose_vmem_limit(
            tile_rows, dim, x.dtype, out_dtype, w_dtype, vmem_cap),
    )

    # dim stays the full last axis (lane-dense: full-width unmasked stores for
    # dim that is a multiple of 128; dim == array extent is always legal).
    # TODO(synk): if this norm is ever used with dim < 128, fold row pairs into
    # the lane axis and do a segmented reduce to avoid masked partial stores.
    row_spec = pl.BlockSpec((tile_rows, dim), lambda i: (i, 0))

    if elementwise_affine:
        kernel = functools.partial(_rmsnorm_affine_kernel, eps=eps, x_dtype=x.dtype)
        in_specs = [row_spec, pl.BlockSpec((1, dim), lambda i: (0, 0))]
        operands = (x2d, w2d)
    else:
        kernel = functools.partial(_rmsnorm_kernel, eps=eps, x_dtype=x.dtype)
        in_specs = [row_spec]
        operands = (x2d,)

    out = pl.pallas_call(
        kernel,
        out_shape=jax.ShapeDtypeStruct((rows, dim), out_dtype),
        grid_spec=pltpu.PrefetchScalarGridSpec(
            num_scalar_prefetch=0,
            grid=grid,
            in_specs=in_specs,
            out_specs=row_spec,
        ),
        compiler_params=compiler_params,
        cost_estimate=cost,
    )(*operands)

    return out.reshape(orig_shape[:-1] + (dim,))


# ---------------------------------------------------------------------------
# Reference + self-test
# ---------------------------------------------------------------------------

def _reference(x, weight, eps=1e-6):
    xf = x.astype(jnp.float32)
    ms = jnp.mean(xf * xf, axis=-1, keepdims=True)
    normed = (xf * jax.lax.rsqrt(ms + eps)).astype(x.dtype)
    if weight is not None:
        normed = normed * weight
    return normed


if __name__ == "__main__":
    key = jax.random.PRNGKey(0)
    batch, seq, dim = 2, 8, 128  # dim = last axis, normalized over

    x = jax.random.normal(key, (batch, seq, dim), dtype=jnp.float32)
    # Module inits weight to ones; perturb deterministically so the affine
    # path is actually exercised.
    weight = jnp.ones((dim,), dtype=jnp.float32) + 0.01 * jnp.arange(
        dim, dtype=jnp.float32) / dim

    # Affine path (f32 in / f32 weight).
    out = stepvideo_rmsnorm(x, weight, eps=1e-6)
    out = jax.block_until_ready(out)
    ref = _reference(x, weight, eps=1e-6)
    assert out.shape == x.shape, (out.shape, x.shape)
    assert out.dtype == x.dtype
    assert jnp.allclose(out, ref, atol=1e-5, rtol=1e-5), "affine mismatch vs reference"

    # No-affine path (elementwise_affine=False).
    out_na = stepvideo_rmsnorm(x, None, eps=1e-6)
    out_na = jax.block_until_ready(out_na)
    ref_na = _reference(x, None, eps=1e-6)
    assert out_na.shape == x.shape
    assert jnp.allclose(out_na, ref_na, atol=1e-5, rtol=1e-5), "no-affine mismatch vs reference"

    # bf16 activations with f32 weight: output stays bf16 (writeback-optimal).
    x_bf16 = x.astype(jnp.bfloat16)
    out_bf = stepvideo_rmsnorm(x_bf16, weight, eps=1e-6)
    out_bf = jax.block_until_ready(out_bf)
    ref_bf = _reference(x_bf16, weight.astype(jnp.bfloat16), eps=1e-6)
    assert out_bf.dtype == jnp.bfloat16
    assert jnp.allclose(out_bf.astype(jnp.float32), ref_bf.astype(jnp.float32),
                        atol=3e-2, rtol=3e-2), "bf16 mismatch vs reference"

    print("KERNEL_OK")
</pallas_src>

<mosaic_0001>
module attributes {stable_mosaic.version = 11 : i64} {
  func.func @_rmsnorm_affine_kernel(%arg0: i32, %arg1: memref<16x128xf32, #tpu.memory_space<vmem>>, %arg2: memref<1x128xf32, #tpu.memory_space<vmem>>, %arg3: memref<16x128xf32, #tpu.memory_space<vmem>>) attributes {dimension_semantics = [#tpu.dimension_semantics<parallel>], iteration_bounds = array<i64: 1>, scalar_prefetch = 0 : i64, scratch_operands = 0 : i64, tpu.core_type = #tpu.core_type<tc>, window_params = [{transform_indices = @transform_0, window_bounds = array<i64: 16, 128>}, {pipeline_mode = #tpu.pipeline_mode<synchronous>, transform_indices = @transform_1, window_bounds = array<i64: 1, 128>}, {transform_indices = @transform_2, window_bounds = array<i64: 16, 128>}]} {
    %c0 = arith.constant 0 : index
    %c0_0 = arith.constant 0 : index
    %0 = vector.load %arg1[%c0, %c0_0] : memref<16x128xf32, #tpu.memory_space<vmem>>, vector<16x128xf32>
    %1 = arith.mulf %0, %0 : vector<16x128xf32>
    %cst = arith.constant dense<0.000000e+00> : vector<16xf32>
    %2 = vector.multi_reduction <add>, %1, %cst [1] : vector<16x128xf32> to vector<16xf32>
    %3 = vector.shape_cast %2 : vector<16xf32> to vector<16x1xf32>
    %cst_1 = arith.constant 1.280000e+02 : f32
    %4 = vector.broadcast %cst_1 : f32 to vector<16x1xf32>
    %5 = arith.divf %3, %4 : vector<16x1xf32>
    %cst_2 = arith.constant 9.99999997E-7 : f32
    %6 = vector.broadcast %cst_2 : f32 to vector<16x1xf32>
    %7 = arith.addf %5, %6 : vector<16x1xf32>
    %8 = math.rsqrt %7 : vector<16x1xf32>
    %9 = vector.broadcast %8 : vector<16x1xf32> to vector<16x128xf32>
    %10 = arith.mulf %0, %9 : vector<16x128xf32>
    %c0_3 = arith.constant 0 : index
    %c0_4 = arith.constant 0 : index
    %11 = vector.load %arg2[%c0_3, %c0_4] : memref<1x128xf32, #tpu.memory_space<vmem>>, vector<1x128xf32>
    %12 = vector.broadcast %11 : vector<1x128xf32> to vector<16x128xf32>
    %13 = arith.mulf %10, %12 : vector<16x128xf32>
    %c0_5 = arith.constant 0 : index
    %c0_6 = arith.constant 0 : index
    %14 = vector.load %arg3[%c0_5, %c0_6] : memref<16x128xf32, #tpu.memory_space<vmem>>, vector<16x128xf32>
    tpu.vector_store %arg3[%c0_5, %c0_6], %13 {strides = array<i32>} : memref<16x128xf32, #tpu.memory_space<vmem>>, vector<16x128xf32>,
    return
  }
  func.func @transform_0(%arg0: i32) -> (i32, i32) {
    %c0_i32 = arith.constant 0 : i32
    %c0_i32_0 = arith.constant 0 : i32
    return %arg0, %c0_i32 : i32, i32
  }
  func.func @transform_1(%arg0: i32) -> (i32, i32) {
    %c0_i32 = arith.constant 0 : i32
    %c0_i32_0 = arith.constant 0 : i32
    %c0_i32_1 = arith.constant 0 : i32
    return %c0_i32, %c0_i32_0 : i32, i32
  }
  func.func @transform_2(%arg0: i32) -> (i32, i32) {
    %c0_i32 = arith.constant 0 : i32
    %c0_i32_0 = arith.constant 0 : i32
    return %arg0, %c0_i32 : i32, i32
  }
}

</mosaic_0001>

<bundles_post_ra>
// kernel: tpu_custom_call.1
= control target key start
LH: loop header
LB: loop body
LE: loop exit
PB: predicated region body
PF: predicated region fallthrough
CT: control target
= control target key end

     0   :  { %7 = vsyncpa [#allocation3], 0  ;;  %s180_s0 = inlined_call_operand.hbm [shape: f32[16,128], index: 0, kind: input, shape index: {}]   ;;  %s181_s1 = inlined_call_operand.vmem [shape: f32[1,128], index: 1, kind: input, shape index: {}]   ;;  %s182_s2 = inlined_call_operand.hbm [shape: f32[16,128], index: 2, kind: output, shape index: {}]  }
   0x1   :  { %8 = vsyncpa [#allocation4], 0  ;;  %s128_s9 = smov [#allocation2]   ;;  %s80_s13 = scalar_lea.hbm %s180_s0, 256 }
   0x2   :  { %s14_s10 = sshll.u32 %s128_s9, 4  ;;  %p81_p0 = scmp.ne.s32.totalorder %s180_s0, %s80_s13  ;;  %s15_s10 = int_to_ptr.vmem [resolvable:$true] %s14_s10 }
   0x3   :  { %p84_p1 = scmp.lt.u32.totalorder %s80_s13, %s180_s0 }
   0x5   :  { %p86_p2 = pnand %p84_p1, %p81_p0 }
   0x7   :  { %89 = shalt.err (!%p86_p2)
}
   0x8   :  { %s90_s18 = scalar_lea.vmem %s15_s10, 256  ;;  %p95_p4 = scmp.lt.s32.totalorder %s15_s10, %s15_s10 }
   0x9   :  { %p91_p3 = scmp.ne.s32.totalorder %s15_s10, %s90_s18  ;;  %p96_p5 = scmp.lt.s32.totalorder %s90_s18, %s90_s18 }
   0xb   :  { %p97_p6 = por %p96_p5, %p95_p4 }
   0xd   :  { %p98_p7 = pnand %p97_p6, %p91_p3 }
   0xf   :  { %101 = shalt.err (!%p98_p7)
}
  0x10   :  { %s129_s19 = smov 128   ;;  %s130_s20 = smov 8  }
  0x11   :  { %20 = dma.hbm_to_vmem [thread:$0]  %s180_s0, 256, %s15_s10, [#allocation3], %s129_s19, %s129_s19, %s130_s20  }
  0x12   :  { %124 = dma.done.wait [#allocation3], 256  }
  0x13   :  { %125 = vsyncadd [#allocation3], 4294967040  ;;  %v26_v0 = vld [vmem:[#allocation2] sm:$0xff]  ;;  %v27_v1 = vld [vmem:[#allocation2 + $0x8] sm:$0xff]  ;;  %s131_s0 = smov [#allocation5]  }
  0x14   :  { %v28_v2 = vmul.f32 %v26_v0, %v26_v0  ;;  %v29_v3 = vmul.f32 %v27_v1, %v27_v1  ;;  %v71_v11 = vld [vmem:[%s181_s1] ss:$0 sm:$0xff]  ;;  %s59_s25 = sshll.u32 %s131_s0, 4  ;;  %s60_s25 = int_to_ptr.vmem [resolvable:$true] %s59_s25 }
  0x15   :  { %s102_s26 = scalar_lea.vmem %s60_s25, 256  ;;  %p107_p9 = scmp.lt.s32.totalorder %s60_s25, %s60_s25 }
  0x16   :  { %30 = vadd.xlane.f32.xlu0 %v28_v2  ;;  %p103_p8 = scmp.ne.s32.totalorder %s60_s25, %s102_s26  ;;  %p108_p10 = scmp.lt.s32.totalorder %s102_s26, %s102_s26 }
  0x18   :  { %p109_p11 = por %p108_p10, %p107_p9 }
  0x1a   :  { %32 = vadd.xlane.f32.xlu0 %v29_v3  ;;  %p110_p12 = pnand %p109_p11, %p103_p8 }
  0xa3   :  { %v31_v4 = vpop.xlane.xlu0 %30 }
  0xa4   :  { %v35_v5 = vmul.f32 0.0078125, %v31_v4 }
  0xa6   :  { %v37_v6 = vadd.f32 1e-06, %v35_v5 }
  0xa7   :  { %v33_v7 = vpop.xlane.xlu0 %32 }
  0xa8   :  { %76 = vrsqrt.f32 %v37_v6  ;;  %v36_v8 = vmul.f32 0.0078125, %v33_v7 }
  0xaa   :  { %v38_v9 = vadd.f32 1e-06, %v36_v8 }
  0xac   :  { %78 = vrsqrt.f32 %v38_v9 }
  0xb2   :  { %v77_v10 = vpop.eup %76 }
  0xb3   :  { %v41_v12 = vmul.f32 %v77_v10, %v26_v0 }
  0xb5   :  { %v50_v13 = vmul.f32 %v71_v11, %v41_v12 }
  0xb6   :  { %v79_v14 = vpop.eup %78 }
  0xb7   :  { %v42_v15 = vmul.f32 %v79_v14, %v27_v1  ;;  %52 = vst [vmem:[#allocation5] sm:$0xff] %v50_v13 }
  0xb9   :  { %v51_v16 = vmul.f32 %v71_v11, %v42_v15 }
  0xbb   :  { %53 = vst [vmem:[#allocation5 + $0x8] sm:$0xff] %v51_v16 }
  0xbc   :  { %113 = shalt.err (!%p110_p12)
}
  0xbd   :  { %s114_s1 = scalar_lea.hbm %s182_s2, 256 }
  0xbe   :  { %p115_p13 = scmp.ne.s32.totalorder %s182_s2, %s114_s1  ;;  %p118_p0 = scmp.lt.u32.totalorder %s114_s1, %s182_s2 }
  0xc0   :  { %p120_p1 = pnand %p118_p0, %p115_p13 }
  0xc2   :  { %123 = shalt.err (!%p120_p1)
}
  0xc3   :  { %65 = dma.vmem_to_hbm [thread:$0]  %s60_s25, 256, %s182_s2, [#allocation4], %s129_s19, %s129_s19, %s130_s20  }
  0xc4   :  { %126 = dma.done.wait [#allocation4], 256  }
  0xc5   :  { %127 = vsyncadd [#allocation4], 4294967040 }
  0xc6   :  { %69 = vsyncpa [#allocation3], 1 }
  0xc7   :  { %70 = vsyncpa [#allocation4], 1 }

</bundles_post_ra>
